<compile_context>
chip_gen: v6e
topology: v6e:2x2x1
jax: 0.10.0
libtpu: 0.0.40
codegen_flags: <defaults>
</compile_context>

<pallas_src>
import jax
import jax.numpy as jnp
from jax.experimental import pallas as pl
from jax.experimental.pallas import tpu as pltpu

IN_DIM, H1, H2, OUT_DIM = 28 * 28, 128, 64, 10
OUT_PAD = 128                 # lane-dense output width (multiple of 128)
MAX_TB = 1024                 # max batch-tile rows per grid step


def _round_up(a: int, m: int) -> int:
    return (a + m - 1) // m * m


def mlp_kernel(x_ref, w1_ref, b1_ref, w2_ref, b2_ref, w3_ref, b3_ref, o_ref):
    # Flattened image tile, cast to bf16 in-kernel (avoids a separate pad/cast
    # pass over x in HBM; MXU accumulates in fp32).
    x = x_ref[...].astype(jnp.bfloat16)                                   # (TB, 784)
    # Layer 1: (TB, 784) @ (784, 128) -> fp32, +bias, ReLU
    h1 = jnp.dot(x, w1_ref[...], preferred_element_type=jnp.float32)
    h1 = jnp.maximum(h1 + b1_ref[...], 0.0).astype(jnp.bfloat16)          # (TB, 128)
    # Layer 2: (TB, 128) @ (128, 64) -> fp32, +bias, ReLU
    h2 = jnp.dot(h1, w2_ref[...], preferred_element_type=jnp.float32)
    h2 = jnp.maximum(h2 + b2_ref[...], 0.0).astype(jnp.bfloat16)          # (TB, 64)
    # Layer 3: (TB, 64) @ (64, 128-padded) -> fp32, +bias
    logits = jnp.dot(h2, w3_ref[...], preferred_element_type=jnp.float32)
    o_ref[...] = (logits + b3_ref[...]).astype(o_ref.dtype)               # (TB, 128)


def init_params(key):
    """Logical (PyTorch-equivalent) fp32 params, stored transposed as (in, out)."""
    ks = jax.random.split(key, 6)

    def lin(kw, kb, fan_in, fan_out):
        bound = 1.0 / jnp.sqrt(fan_in)
        w = jax.random.uniform(kw, (fan_in, fan_out), jnp.float32, -bound, bound)
        b = jax.random.uniform(kb, (1, fan_out), jnp.float32, -bound, bound)
        return w, b

    w1, b1 = lin(ks[0], ks[1], IN_DIM, H1)
    w2, b2 = lin(ks[2], ks[3], H1, H2)
    w3, b3 = lin(ks[4], ks[5], H2, OUT_DIM)
    return (w1, b1, w2, b2, w3, b3)


def prepare_params(params):
    """One-time cast/pad for the kernel: bf16 weights, lane-dense padded last layer."""
    w1, b1, w2, b2, w3, b3 = params
    w1p = w1.astype(jnp.bfloat16)                                          # (784, 128)
    w2p = w2.astype(jnp.bfloat16)                                          # (128, 64)
    w3p = jnp.pad(w3, ((0, 0), (0, OUT_PAD - OUT_DIM))).astype(jnp.bfloat16)  # (64, 128)
    b3p = jnp.pad(b3, ((0, 0), (0, OUT_PAD - OUT_DIM)))                    # (1, 128) f32
    return (w1p, b1, w2p, b2, w3p, b3p)


@jax.jit
def neural_net_forward(x_nchw, prepared_params):
    """x_nchw: (B, 1, 28, 28) float32. Returns logits (B, 10) float32."""
    w1, b1, w2, b2, w3, b3 = prepared_params
    B = x_nchw.shape[0]

    # Batch tiling: n_tiles grid steps of tb rows each (tb multiple of 8, <= MAX_TB).
    n_tiles = -(-B // MAX_TB)
    tb = _round_up(-(-B // n_tiles), 8)
    b_pad = tb * n_tiles

    # nn.Flatten (C=1, row-major); zero-pad batch only if needed (feature dim stays 784).
    x_flat = x_nchw.reshape(B, IN_DIM)
    if b_pad != B:
        x_flat = jnp.pad(x_flat, ((0, b_pad - B), (0, 0)))

    flops = 2 * b_pad * (IN_DIM * H1 + H1 * H2 + H2 * OUT_PAD)
    bytes_accessed = (
        b_pad * IN_DIM * 4                                     # streamed x (f32)
        + (IN_DIM * H1 + H1 * H2 + H2 * OUT_PAD) * 2           # resident weights (bf16)
        + (H1 + H2 + OUT_PAD) * 4                              # biases (f32)
        + b_pad * OUT_PAD * 4                                  # output (f32)
    )

    out_pad = pl.pallas_call(
        mlp_kernel,
        out_shape=jax.ShapeDtypeStruct((b_pad, OUT_PAD), jnp.float32),
        grid=(n_tiles,),
        in_specs=[
            pl.BlockSpec((tb, IN_DIM), lambda i: (i, 0)),      # x tile, double-buffered
            pl.BlockSpec((IN_DIM, H1), lambda i: (0, 0)),      # W1 resident (bf16)
            pl.BlockSpec((1, H1), lambda i: (0, 0)),           # b1 resident
            pl.BlockSpec((H1, H2), lambda i: (0, 0)),          # W2 resident (bf16)
            pl.BlockSpec((1, H2), lambda i: (0, 0)),           # b2 resident
            pl.BlockSpec((H2, OUT_PAD), lambda i: (0, 0)),     # W3 resident (padded)
            pl.BlockSpec((1, OUT_PAD), lambda i: (0, 0)),      # b3 resident (padded)
        ],
        out_specs=pl.BlockSpec((tb, OUT_PAD), lambda i: (i, 0)),
        compiler_params=pltpu.CompilerParams(
            dimension_semantics=("parallel",),
        ),
        cost_estimate=pl.CostEstimate(
            flops=flops, transcendentals=0, bytes_accessed=bytes_accessed),
    )(x_flat, w1, b1, w2, b2, w3, b3)

    return out_pad[:B, :OUT_DIM]


def reference_forward_fp32(x_nchw, params):
    """Pure fp32 reference (exact PyTorch semantics)."""
    w1, b1, w2, b2, w3, b3 = params
    x = x_nchw.reshape(x_nchw.shape[0], IN_DIM)
    h = jnp.maximum(x @ w1 + b1, 0.0)
    h = jnp.maximum(h @ w2 + b2, 0.0)
    return h @ w3 + b3


def reference_forward_bf16(x_nchw, params):
    """Reference mirroring the kernel's bf16-operand / fp32-accumulate scheme."""
    w1, b1, w2, b2, w3, b3 = params
    x = x_nchw.reshape(x_nchw.shape[0], IN_DIM).astype(jnp.bfloat16)
    h = jnp.dot(x, w1.astype(jnp.bfloat16), preferred_element_type=jnp.float32)
    h = jnp.maximum(h + b1, 0.0).astype(jnp.bfloat16)
    h = jnp.dot(h, w2.astype(jnp.bfloat16), preferred_element_type=jnp.float32)
    h = jnp.maximum(h + b2, 0.0).astype(jnp.bfloat16)
    out = jnp.dot(h, w3.astype(jnp.bfloat16), preferred_element_type=jnp.float32)
    return out + b3


if __name__ == "__main__":
    key = jax.random.PRNGKey(0)
    k_x, k_p = jax.random.split(key)

    B = 8
    x = jax.random.normal(k_x, (B, 1, 28, 28), dtype=jnp.float32)  # NCHW like PyTorch
    params = init_params(k_p)
    prepared = prepare_params(params)

    logits = neural_net_forward(x, prepared)
    logits = jax.block_until_ready(logits)
    assert logits.shape == (B, OUT_DIM)

    # Tight check vs. a bf16-matched reference, loose check vs. pure fp32.
    ref_bf16 = reference_forward_bf16(x, params)
    ref_fp32 = reference_forward_fp32(x, params)
    assert jnp.allclose(logits, ref_bf16, atol=2e-3, rtol=2e-3)
    assert jnp.allclose(logits, ref_fp32, atol=5e-2, rtol=5e-2)

    print("KERNEL_OK")
</pallas_src>

<mosaic_0001>
module attributes {stable_mosaic.version = 11 : i64} {
  func.func @mlp_kernel(%arg0: i32, %arg1: memref<8x784xf32, #tpu.memory_space<vmem>>, %arg2: memref<784x128xbf16, #tpu.memory_space<vmem>>, %arg3: memref<1x128xf32, #tpu.memory_space<vmem>>, %arg4: memref<128x64xbf16, #tpu.memory_space<vmem>>, %arg5: memref<1x64xf32, #tpu.memory_space<vmem>>, %arg6: memref<64x128xbf16, #tpu.memory_space<vmem>>, %arg7: memref<1x128xf32, #tpu.memory_space<vmem>>, %arg8: memref<8x128xf32, #tpu.memory_space<vmem>>) attributes {dimension_semantics = [#tpu.dimension_semantics<parallel>], iteration_bounds = array<i64: 1>, scalar_prefetch = 0 : i64, scratch_operands = 0 : i64, tpu.core_type = #tpu.core_type<tc>, window_params = [{transform_indices = @transform_0, window_bounds = array<i64: 8, 784>}, {pipeline_mode = #tpu.pipeline_mode<synchronous>, transform_indices = @transform_1, window_bounds = array<i64: 784, 128>}, {pipeline_mode = #tpu.pipeline_mode<synchronous>, transform_indices = @transform_2, window_bounds = array<i64: 1, 128>}, {pipeline_mode = #tpu.pipeline_mode<synchronous>, transform_indices = @transform_3, window_bounds = array<i64: 128, 64>}, {pipeline_mode = #tpu.pipeline_mode<synchronous>, transform_indices = @transform_4, window_bounds = array<i64: 1, 64>}, {pipeline_mode = #tpu.pipeline_mode<synchronous>, transform_indices = @transform_5, window_bounds = array<i64: 64, 128>}, {pipeline_mode = #tpu.pipeline_mode<synchronous>, transform_indices = @transform_6, window_bounds = array<i64: 1, 128>}, {transform_indices = @transform_7, window_bounds = array<i64: 8, 128>}]} {
    %c0 = arith.constant 0 : index
    %c0_0 = arith.constant 0 : index
    %0 = vector.load %arg1[%c0, %c0_0] : memref<8x784xf32, #tpu.memory_space<vmem>>, vector<8x784xf32>
    %1 = arith.truncf %0 : vector<8x784xf32> to vector<8x784xbf16>
    %c0_1 = arith.constant 0 : index
    %c0_2 = arith.constant 0 : index
    %2 = vector.load %arg2[%c0_1, %c0_2] : memref<784x128xbf16, #tpu.memory_space<vmem>>, vector<784x128xbf16>
    %cst = arith.constant dense<0.000000e+00> : vector<8x128xf32>
    %3 = tpu.matmul %1, %2, %cst {dimension_numbers = #tpu.dot_dimension_numbers<[1], [0], [0], [1], [0, 0, 1, 1], [], []>} : vector<8x784xbf16>, vector<784x128xbf16>, vector<8x128xf32> -> vector<8x128xf32>
    %c0_3 = arith.constant 0 : index
    %c0_4 = arith.constant 0 : index
    %4 = vector.load %arg3[%c0_3, %c0_4] : memref<1x128xf32, #tpu.memory_space<vmem>>, vector<1x128xf32>
    %5 = vector.broadcast %4 : vector<1x128xf32> to vector<8x128xf32>
    %6 = arith.addf %3, %5 : vector<8x128xf32>
    %cst_5 = arith.constant 0.000000e+00 : f32
    %7 = vector.broadcast %cst_5 : f32 to vector<8x128xf32>
    %8 = arith.maximumf %6, %7 : vector<8x128xf32>
    %9 = arith.truncf %8 : vector<8x128xf32> to vector<8x128xbf16>
    %c0_6 = arith.constant 0 : index
    %c0_7 = arith.constant 0 : index
    %10 = vector.load %arg4[%c0_6, %c0_7] : memref<128x64xbf16, #tpu.memory_space<vmem>>, vector<128x64xbf16>
    %cst_8 = arith.constant dense<0.000000e+00> : vector<8x64xf32>
    %11 = tpu.matmul %9, %10, %cst_8 {dimension_numbers = #tpu.dot_dimension_numbers<[1], [0], [0], [1], [0, 0, 1, 1], [], []>} : vector<8x128xbf16>, vector<128x64xbf16>, vector<8x64xf32> -> vector<8x64xf32>
    %c0_9 = arith.constant 0 : index
    %c0_10 = arith.constant 0 : index
    %12 = vector.load %arg5[%c0_9, %c0_10] : memref<1x64xf32, #tpu.memory_space<vmem>>, vector<1x64xf32>
    %13 = vector.broadcast %12 : vector<1x64xf32> to vector<8x64xf32>
    %14 = arith.addf %11, %13 : vector<8x64xf32>
    %cst_11 = arith.constant 0.000000e+00 : f32
    %15 = vector.broadcast %cst_11 : f32 to vector<8x64xf32>
    %16 = arith.maximumf %14, %15 : vector<8x64xf32>
    %17 = arith.truncf %16 : vector<8x64xf32> to vector<8x64xbf16>
    %c0_12 = arith.constant 0 : index
    %c0_13 = arith.constant 0 : index
    %18 = vector.load %arg6[%c0_12, %c0_13] : memref<64x128xbf16, #tpu.memory_space<vmem>>, vector<64x128xbf16>
    %cst_14 = arith.constant dense<0.000000e+00> : vector<8x128xf32>
    %19 = tpu.matmul %17, %18, %cst_14 {dimension_numbers = #tpu.dot_dimension_numbers<[1], [0], [0], [1], [0, 0, 1, 1], [], []>} : vector<8x64xbf16>, vector<64x128xbf16>, vector<8x128xf32> -> vector<8x128xf32>
    %c0_15 = arith.constant 0 : index
    %c0_16 = arith.constant 0 : index
    %20 = vector.load %arg7[%c0_15, %c0_16] : memref<1x128xf32, #tpu.memory_space<vmem>>, vector<1x128xf32>
    %21 = vector.broadcast %20 : vector<1x128xf32> to vector<8x128xf32>
    %22 = arith.addf %19, %21 : vector<8x128xf32>
    %c0_17 = arith.constant 0 : index
    %c0_18 = arith.constant 0 : index
    %23 = vector.load %arg8[%c0_17, %c0_18] : memref<8x128xf32, #tpu.memory_space<vmem>>, vector<8x128xf32>
    tpu.vector_store %arg8[%c0_17, %c0_18], %22 {strides = array<i32>} : memref<8x128xf32, #tpu.memory_space<vmem>>, vector<8x128xf32>,
    return
  }
  func.func @transform_0(%arg0: i32) -> (i32, i32) {
    %c0_i32 = arith.constant 0 : i32
    %c0_i32_0 = arith.constant 0 : i32
    return %arg0, %c0_i32 : i32, i32
  }
  func.func @transform_1(%arg0: i32) -> (i32, i32) {
    %c0_i32 = arith.constant 0 : i32
    %c0_i32_0 = arith.constant 0 : i32
    %c0_i32_1 = arith.constant 0 : i32
    return %c0_i32, %c0_i32_0 : i32, i32
  }
  func.func @transform_2(%arg0: i32) -> (i32, i32) {
    %c0_i32 = arith.constant 0 : i32
    %c0_i32_0 = arith.constant 0 : i32
    %c0_i32_1 = arith.constant 0 : i32
    return %c0_i32, %c0_i32_0 : i32, i32
  }
  func.func @transform_3(%arg0: i32) -> (i32, i32) {
    %c0_i32 = arith.constant 0 : i32
    %c0_i32_0 = arith.constant 0 : i32
    %c0_i32_1 = arith.constant 0 : i32
    return %c0_i32, %c0_i32_0 : i32, i32
  }
  func.func @transform_4(%arg0: i32) -> (i32, i32) {
    %c0_i32 = arith.constant 0 : i32
    %c0_i32_0 = arith.constant 0 : i32
    %c0_i32_1 = arith.constant 0 : i32
    return %c0_i32, %c0_i32_0 : i32, i32
  }
  func.func @transform_5(%arg0: i32) -> (i32, i32) {
    %c0_i32 = arith.constant 0 : i32
    %c0_i32_0 = arith.constant 0 : i32
    %c0_i32_1 = arith.constant 0 : i32
    return %c0_i32, %c0_i32_0 : i32, i32
  }
  func.func @transform_6(%arg0: i32) -> (i32, i32) {
    %c0_i32 = arith.constant 0 : i32
    %c0_i32_0 = arith.constant 0 : i32
    %c0_i32_1 = arith.constant 0 : i32
    return %c0_i32, %c0_i32_0 : i32, i32
  }
  func.func @transform_7(%arg0: i32) -> (i32, i32) {
    %c0_i32 = arith.constant 0 : i32
    %c0_i32_0 = arith.constant 0 : i32
    return %arg0, %c0_i32 : i32, i32
  }
}

</mosaic_0001>

<bundles_post_ra>
// kernel: neural_net_forward.1
= control target key start
LH: loop header
LB: loop body
LE: loop exit
PB: predicated region body
PF: predicated region fallthrough
CT: control target
= control target key end

     0   :  { %v1090_v44 = vmov 0.0   ;;  %vm1091_vm0 = vmmov 0   ;;  %vm441_vm1 = vcmask 130048   ;;  %s1368_s0 = inlined_call_operand.vmem [shape: f32[8,784], index: 0, kind: input, shape index: {}]   ;;  %s1369_s1 = inlined_call_operand.vmem [shape: bf16[784,128], index: 1, kind: input, shape index: {}]   ;;  %s1370_s2 = inlined_call_operand.vmem [shape: f32[1,128], index: 2, kind: input, shape index: {}]   ;;  %s1371_s3 = inlined_call_operand.vmem [shape: bf16[128,64], index: 3, kind: input, shape index: {}]   ;;  %s1372_s4 = inlined_call_operand.vmem [shape: f32[1,64], index: 4, kind: input, shape index: {}]   ;;  %s1373_s5 = inlined_call_operand.vmem [shape: bf16[64,128], index: 5, kind: input, shape index: {}]   ;;  %s1374_s6 = inlined_call_operand.vmem [shape: f32[1,128], index: 6, kind: input, shape index: {}]   ;;  %s1375_s7 = inlined_call_operand.hbm [shape: f32[8,128], index: 7, kind: output, shape index: {}]  }
   0x1   :  { %v1007_v0 = vld [vmem:[%s1369_s1 + $0x78] sm:$0xff]   ;;  %v1011_v4 = vld [vmem:[%s1369_s1 + $0x70] sm:$0xff]   ;;  %v1015_v8 = vld [vmem:[%s1369_s1 + $0x68] sm:$0xff]  }
   0x2   :  { %v1008_v1 = vld [vmem:[%s1369_s1 + $0x38] sm:$0xff]   ;;  %884 = vmatprep.subr.bf16.mxu0 %v1007_v0  ;;  %v1012_v5 = vld [vmem:[%s1369_s1 + $0x30] sm:$0xff]   ;;  %v1016_v9 = vld [vmem:[%s1369_s1 + $0x28] sm:$0xff]  }
   0x3   :  { %v1009_v2 = vld [vmem:[%s1369_s1 + $0xf8] sm:$0xff]   ;;  %885 = vmatpush3.bf16.msra.mxu0 %v1008_v1  ;;  %v1013_v6 = vld [vmem:[%s1369_s1 + $0xf0] sm:$0xff]   ;;  %v1017_v10 = vld [vmem:[%s1369_s1 + $0xe8] sm:$0xff]  }
   0x4   :  { %v1010_v3 = vld [vmem:[%s1369_s1 + $0xb8] sm:$0xff]   ;;  %906 = vmatprep.subr.bf16.mxu1 %v1009_v2  ;;  %886 = vmatprep.subr.bf16.mxu0 %v1011_v4  ;;  %v1014_v7 = vld [vmem:[%s1369_s1 + $0xb0] sm:$0xff]   ;;  %v1018_v11 = vld [vmem:[%s1369_s1 + $0xa8] sm:$0xff]  }
   0x5   :  { %907 = vmatpush3.bf16.msra.mxu1 %v1010_v3  ;;  %v1019_v12 = vld [vmem:[%s1369_s1 + $0x60] sm:$0xff]   ;;  %v1023_v16 = vld [vmem:[%s1369_s1 + $0x58] sm:$0xff]   ;;  %v1027_v20 = vld [vmem:[%s1369_s1 + $0x50] sm:$0xff]  }
   0x6   :  { %908 = vmatprep.subr.bf16.mxu1 %v1013_v6  ;;  %v1020_v13 = vld [vmem:[%s1369_s1 + $0x20] sm:$0xff]   ;;  %v1024_v17 = vld [vmem:[%s1369_s1 + $0x18] sm:$0xff]   ;;  %v1028_v21 = vld [vmem:[%s1369_s1 + $0x10] sm:$0xff]  }
   0x7   :  { %887 = vmatpush3.bf16.msra.mxu0 %v1012_v5  ;;  %v1021_v14 = vld [vmem:[%s1369_s1 + $0xe0] sm:$0xff]   ;;  %v1025_v18 = vld [vmem:[%s1369_s1 + $0xd8] sm:$0xff]   ;;  %v1029_v22 = vld [vmem:[%s1369_s1 + $0xd0] sm:$0xff]  }
   0x8   :  { %888 = vmatprep.subr.bf16.mxu0 %v1015_v8  ;;  %v1022_v15 = vld [vmem:[%s1369_s1 + $0xa0] sm:$0xff]   ;;  %v1026_v19 = vld [vmem:[%s1369_s1 + $0x98] sm:$0xff]   ;;  %v1030_v23 = vld [vmem:[%s1369_s1 + $0x90] sm:$0xff]  }
   0x9   :  { %909 = vmatpush3.bf16.msra.mxu1 %v1014_v7  ;;  %v1031_v24 = vld [vmem:[%s1369_s1 + $0x48] sm:$0xff]   ;;  %v1035_v28 = vld [vmem:[%s1369_s1 + $0x40] sm:$0xff]   ;;  %v1039_v36 = vld [vmem:[%s1369_s1 + $0x178] sm:$0xff]  }
   0xa   :  { %910 = vmatprep.subr.bf16.mxu1 %v1017_v10  ;;  %v1032_v25 = vld [vmem:[%s1369_s1 + $0x8] sm:$0xff]   ;;  %v1036_v29 = vld [vmem:[%s1369_s1] sm:$0xff]   ;;  %v31_v37 = vld [vmem:[%s1368_s0 + $0x18] sm:$0xff] }
   0xb   :  { %889 = vmatpush3.bf16.msra.mxu0 %v1016_v9  ;;  %v1033_v26 = vld [vmem:[%s1369_s1 + $0xc8] sm:$0xff]   ;;  %v1037_v30 = vld [vmem:[%s1369_s1 + $0xc0] sm:$0xff]   ;;  %v38_v38 = vpack.c.bf16 %v31_v37, %v31_v37  ;;  %v1040_v39 = vld [vmem:[%s1369_s1 + $0x138] sm:$0xff]  }
   0xc   :  { %890 = vmatprep.subr.bf16.mxu0 %v1019_v12  ;;  %v1034_v27 = vld [vmem:[%s1369_s1 + $0x88] sm:$0xff]   ;;  %v1038_v33 = vld [vmem:[%s1369_s1 + $0x80] sm:$0xff]   ;;  %v30_v40 = vld [vmem:[%s1368_s0 + $0x10] sm:$0xff] }
   0xd   :  { %911 = vmatpush3.bf16.msra.mxu1 %v1018_v11  ;;  %v29_v31 = vld [vmem:[%s1368_s0 + $0x8] sm:$0xff]  ;;  %v28_v34 = vld [vmem:[%s1368_s0] sm:$0xff]  ;;  %517 = vmatprep.mubr.bf16.mxu1 %v38_v38  ;;  %v37_v41 = vpack.c.bf16 %v30_v40, %v30_v40  ;;  %v1041_v42 = vld [vmem:[%s1369_s1 + $0x170] sm:$0xff]  }
   0xe   :  { %912 = vmatprep.subr.bf16.mxu1 %v1021_v14  ;;  %v36_v32 = vpack.c.bf16 %v29_v31, %v29_v31  ;;  %v35_v35 = vpack.c.bf16 %v28_v34, %v28_v34  ;;  %v1042_v43 = vld [vmem:[%s1369_s1 + $0x130] sm:$0xff]   ;;  %v1043_v45 = vld [vmem:[%s1369_s1 + $0x168] sm:$0xff]   ;;  %v1045_v47 = vld [vmem:[%s1369_s1 + $0x160] sm:$0xff]  }
   0xf   :  { %891 = vmatpush3.bf16.msra.mxu0 %v1020_v13  ;;  %v1044_v46 = vld [vmem:[%s1369_s1 + $0x128] sm:$0xff]   ;;  %v1046_v48 = vld [vmem:[%s1369_s1 + $0x120] sm:$0xff]   ;;  %v1047_v49 = vld [vmem:[%s1369_s1 + $0x158] sm:$0xff]  }
  0x10   :  { %892 = vmatprep.subr.bf16.mxu0 %v1023_v16  ;;  %477 = vmatprep.mubr.bf16.mxu0 %v36_v32  ;;  %v1048_v50 = vld [vmem:[%s1369_s1 + $0x118] sm:$0xff]   ;;  %v1049_v51 = vld [vmem:[%s1369_s1 + $0x150] sm:$0xff]   ;;  %v1055_v53 = vld [vmem:[%s1369_s1 + $0x180] sm:$0xff]  }
  0x11   :  { %913 = vmatpush3.bf16.msra.mxu1 %v1022_v15  ;;  %v1050_v52 = vld [vmem:[%s1369_s1 + $0x110] sm:$0xff]   ;;  %v33_v54 = vld [vmem:[%s1368_s0 + $0x28] sm:$0xff]  ;;  %v1053_v60 = vld [vmem:[%s1369_s1 + $0x140] sm:$0xff]  }
  0x12   :  { %914 = vmatprep.subr.bf16.mxu1 %v1025_v18  ;;  %v1051_v55 = vld [vmem:[%s1369_s1 + $0x148] sm:$0xff]   ;;  %v40_v56 = vpack.c.bf16 %v33_v54, %v33_v54  ;;  %v34_v57 = vld [vmem:[%s1368_s0 + $0x30] sm:$0xff] }
  0x13   :  { %893 = vmatpush3.bf16.msra.mxu0 %v1024_v17  ;;  %v41_v58 = vpack.c.bf16 %v34_v57, %v34_v57  ;;  %v1052_v59 = vld [vmem:[%s1369_s1 + $0x108] sm:$0xff]  }
  0x14   :  { %894 = vmatprep.subr.bf16.mxu0 %v1027_v20 }
  0x15   :  { %915 = vmatpush3.bf16.msra.mxu1 %v1026_v19 }
  0x16   :  { %916 = vmatprep.subr.bf16.mxu1 %v1029_v22 }
  0x17   :  { %895 = vmatpush3.bf16.msra.mxu0 %v1028_v21 }
  0x18   :  { %896 = vmatprep.subr.bf16.mxu0 %v1031_v24 }
  0x19   :  { %917 = vmatpush3.bf16.msra.mxu1 %v1030_v23 }
  0x1a   :  { %918 = vmatprep.subr.bf16.mxu1 %v1033_v26 }
  0x1b   :  { %897 = vmatpush3.bf16.msra.mxu0 %v1032_v25 }
  0x1c   :  { %898 = vmatprep.subr.bf16.mxu0 %v1035_v28 }
  0x1d   :  { %919 = vmatpush3.bf16.msra.mxu1 %v1034_v27 }
  0x1e   :  { %920 = vmatprep.subr.bf16.mxu1 %v1037_v30 }
  0x1f   :  { %899 = vmatpush3.bf16.msra.mxu0 %v1036_v29 }
  0x20   :  { %928 = vmatprep.subr.bf16.mxu0 %v1039_v36 }
  0x21   :  { %921 = vmatpush3.bf16.msra.mxu1 %v1038_v33 }
  0x22   :  { %478 = vmatmul.mubr.bf16.vlgmr.msra.gmra.mxu0 %v35_v35  ;;  %966 = vmatprep.subr.bf16.mxu1 %v1090_v44 }
  0x23   :  { %929 = vmatpush3.bf16.msra.mxu0 %v1040_v39  ;;  %557 = vmatprep.mubr.bf16.mxu0 %v40_v56 }
  0x24   :  { %518 = vmatmul.mubr.bf16.vlgmr.msra.gmra.mxu1 %v37_v41  ;;  %930 = vmatprep.subr.bf16.mxu0 %v1041_v42 }
  0x25   :  { %968 = vmatprep.mubr.msk.bf16.mxu1 %vm1091_vm0, %v1090_v44  ;;  %967 = vmatpush3.bf16.msra.mxu1 %v1055_v53 }
  0x26   :  { %972 = vmatprep.subr.bf16.mxu1 %v1090_v44 }
  0x27   :  { %931 = vmatpush3.bf16.msra.mxu0 %v1042_v43 }
  0x28   :  { %932 = vmatprep.subr.bf16.mxu0 %v1043_v45 }
  0x2b   :  { %933 = vmatpush3.bf16.msra.mxu0 %v1044_v46 }
  0x2c   :  { %934 = vmatprep.subr.bf16.mxu0 %v1045_v47  ;;  %969 = vmatmul.mubr.msk.bf16.vlgmr.msra.gmra.mxu1 %vm441_vm1, %v41_v58 }
  0x2d   :  { %988 = vmatprep.mubr.msk.bf16.mxu1 %vm1091_vm0, %v1090_v44 }
  0x2f   :  { %935 = vmatpush3.bf16.msra.mxu0 %v1046_v48 }
  0x30   :  { %936 = vmatprep.subr.bf16.mxu0 %v1047_v49 }
  0x33   :  { %937 = vmatpush3.bf16.msra.mxu0 %v1048_v50 }
  0x34   :  { %938 = vmatprep.subr.bf16.mxu0 %v1049_v51 }
  0x37   :  { %939 = vmatpush3.bf16.msra.mxu0 %v1050_v52 }
  0x38   :  { %940 = vmatprep.subr.bf16.mxu0 %v1051_v55 }
  0x39   :  { %12 = vsyncpa [#allocation3], 0  ;;  %v1054_v61 = vld [vmem:[%s1369_s1 + $0x100] sm:$0xff]   ;;  %v1056_v0 = vld [vmem:[%s1371_s3 + $0x38] sm:$0xff]   ;;  %vm759_vm2 = vcmask 523264   ;;  %s1092_s1 = smov [#allocation2]  }
  0x3a   :  { %v32_v62 = vld [vmem:[%s1368_s0 + $0x20] sm:$0xff]  ;;  %973 = vmatpush3.bf16.msra.mxu1 %v1056_v0  ;;  %v1057_v1 = vld [vmem:[%s1371_s3 + $0x30] sm:$0xff]   ;;  %v1058_v2 = vld [vmem:[%s1371_s3 + $0x28] sm:$0xff]  }
  0x3b   :  { %941 = vmatpush3.bf16.msra.mxu0 %v1052_v59  ;;  %v39_v63 = vpack.c.bf16 %v32_v62, %v32_v62  ;;  %974 = vmatprep.subr.bf16.mxu1 %v1090_v44  ;;  %v1059_v3 = vld [vmem:[%s1371_s3 + $0x20] sm:$0xff]   ;;  %v1060_v4 = vld [vmem:[%s1371_s3 + $0x18] sm:$0xff]   ;;  %v1061_v5 = vld [vmem:[%s1371_s3 + $0x10] sm:$0xff]  }
  0x3c   :  { %942 = vmatprep.subr.bf16.mxu0 %v1053_v60  ;;  %v1062_v6 = vld [vmem:[%s1371_s3 + $0x8] sm:$0xff]   ;;  %v1063_v7 = vld [vmem:[%s1371_s3] sm:$0xff]   ;;  %v1064_v8 = vld [vmem:[%s1373_s5 + $0x18] sm:$0xff]  }
  0x3d   :  { %v1065_v9 = vld [vmem:[%s1373_s5 + $0x10] sm:$0xff]   ;;  %v818_v23 = vld [vmem:[%s1370_s2] ss:$0 sm:$0xff]  ;;  %v1066_v36 = vld [vmem:[%s1373_s5 + $0x8] sm:$0xff]  }
  0x3e   :  { %975 = vmatpush3.bf16.msra.mxu1 %v1057_v1  ;;  %v1067_v37 = vld [vmem:[%s1373_s5] sm:$0xff]   ;;  %s810_s5 = sshll.u32 %s1092_s1, 4  ;;  %s811_s5 = int_to_ptr.vmem [resolvable:$true] %s810_s5 }
  0x3f   :  { %943 = vmatpush3.bf16.msra.mxu0 %v1054_v61  ;;  %976 = vmatprep.subr.bf16.mxu1 %v1090_v44  ;;  %v869_v38 = vld [vmem:[%s1372_s4] ss:$0 sm:$0xff]  ;;  %s1068_s4 = scalar_lea.vmem %s811_s5, 128  ;;  %p1073_p1 = scmp.lt.s32.totalorder %s811_s5, %s811_s5 }
  0x40   :  { %992 = vmatprep.subr.bf16.mxu0 %v1090_v44  ;;  %p1069_p0 = scmp.ne.s32.totalorder %s811_s5, %s1068_s4  ;;  %p1074_p2 = scmp.lt.s32.totalorder %s1068_s4, %s1068_s4 }
  0x42   :  { %558 = vmatmul.mubr.bf16.vlgmr.msra.gmra.mxu0 %v39_v63  ;;  %977 = vmatpush3.bf16.msra.mxu1 %v1058_v2  ;;  %p1075_p3 = por %p1074_p2, %p1073_p1 }
  0x43   :  { %1000 = vmatprep.mubr.msk.bf16.mxu0 %vm1091_vm0, %v1090_v44  ;;  %978 = vmatprep.subr.bf16.mxu1 %v1090_v44 }
  0x44   :  { %993 = vmatpush3.bf16.msra.mxu0 %v1064_v8  ;;  %p1076_p4 = pnand %p1075_p3, %p1069_p0 }
  0x45   :  { %994 = vmatprep.subr.bf16.mxu0 %v1090_v44 }
  0x46   :  { %979 = vmatpush3.bf16.msra.mxu1 %v1059_v3 }
  0x47   :  { %980 = vmatprep.subr.bf16.mxu1 %v1090_v44 }
  0x48   :  { %995 = vmatpush3.bf16.msra.mxu0 %v1065_v9 }
  0x49   :  { %996 = vmatprep.subr.bf16.mxu0 %v1090_v44 }
  0x4a   :  { %981 = vmatpush3.bf16.msra.mxu1 %v1060_v4 }
  0x4b   :  { %982 = vmatprep.subr.bf16.mxu1 %v1090_v44 }
  0x4c   :  { %997 = vmatpush3.bf16.msra.mxu0 %v1066_v36 }
  0x4d   :  { %998 = vmatprep.subr.bf16.mxu0 %v1090_v44 }
  0x4e   :  { %983 = vmatpush3.bf16.msra.mxu1 %v1061_v5 }
  0x4f   :  { %984 = vmatprep.subr.bf16.mxu1 %v1090_v44 }
  0x50   :  { %999 = vmatpush3.bf16.msra.mxu0 %v1067_v37 }
  0x52   :  { %985 = vmatpush3.bf16.msra.mxu1 %v1062_v6 }
  0x53   :  { %986 = vmatprep.subr.bf16.mxu1 %v1090_v44  ;;  %v878_v44 = vld [vmem:[%s1374_s6] ss:$0 sm:$0xff] }
  0x56   :  { %987 = vmatpush3.bf16.msra.mxu1 %v1063_v7 }
  0xe2   :  { %v900_v10 = vpop.f32.mrf.mxu0 }
  0xe4   :  { %v901_v11 = vpop.f32.mrf.mxu0  ;;  %v922_v12 = vpop.f32.mrf.mxu1 }
  0xe5   :  { %v902_v22 = vadd.f32 %v901_v11, %v900_v10 }
  0xe6   :  { %v903_v13 = vpop.f32.mrf.mxu0  ;;  %v923_v14 = vpop.f32.mrf.mxu1 }
  0xe7   :  { %v480_v24 = vadd.f32 %v902_v22, %v818_v23  ;;  %v924_v25 = vadd.f32 %v923_v14, %v922_v12 }
  0xe8   :  { %v904_v15 = vpop.f32.mrf.mxu0  ;;  %v925_v16 = vpop.f32.mrf.mxu1 }
  0xe9   :  { %v520_v28 = vadd.f32 %v924_v25, %v480_v24 }
  0xea   :  { %v926_v17 = vpop.f32.mrf.mxu1 }
  0xec   :  { %v599_v18 = vpop.f32.mrf.mxu1 }
  0xee   :  { %v970_v19 = vpop.f32.mrf.mxu1 }
  0xf0   :  { %v602_v20 = vpop.f32.mrf.mxu1 }
  0xf2   :  { %v971_v21 = vpop.f32.mrf.mxu1 }
 0x102   :  { %v944_v26 = vpop.f32.mrf.mxu0 }
 0x104   :  { %v945_v27 = vpop.f32.mrf.mxu0 }
 0x105   :  { %v946_v29 = vadd.f32 %v945_v27, %v944_v26 }
 0x106   :  { %v947_v30 = vpop.f32.mrf.mxu0 }
 0x107   :  { %v560_v31 = vadd.f32 %v946_v29, %v520_v28 }
 0x108   :  { %v948_v32 = vpop.f32.mrf.mxu0 }
 0x109   :  { %v600_v33 = vadd.f32 %v599_v18, %v560_v31 }
 0x10b   :  { %v605_v34 = vmax.f32 %v600_v33, 0.0 }
 0x10d   :  { %v606_v35 = vpack.c.bf16 %v605_v34, %v605_v34 }
 0x10f   :  { %989 = vmatmul.mubr.bf16.vlgmr.msra.gmra.mxu1 %v606_v35 }
 0x1cf   :  { %v712_v39 = vpop.f32.mrf.mxu1 }
 0x1d0   :  { %v713_v40 = vadd.f32 %v869_v38, %v712_v39 }
 0x1d1   :  { %v990_v41 = vpop.f32.mrf.mxu1 }
 0x1d2   :  { %v718_v42 = vmax.f32 %v713_v40, 0.0 }
 0x1d3   :  { %v715_v43 = vpop.f32.mrf.mxu1 }
 0x1d4   :  { %v719_v45 = vpack.c.bf16 %v718_v42, %v718_v42 }
 0x1d5   :  { %v991_v46 = vpop.f32.mrf.mxu1 }
 0x1d6   :  { %1001 = vmatmul.mubr.msk.bf16.vlgmr.msra.gmra.mxu0 %vm759_vm2, %v719_v45 }
 0x296   :  { %v797_v47 = vpop.f32.mrf.mxu0 }
 0x297   :  { %v798_v48 = vadd.f32 %v878_v44, %v797_v47 }
 0x298   :  { %v1002_v49 = vpop.f32.mrf.mxu0 }
 0x299   :  { %803 = vst [vmem:[#allocation2] sm:$0xff] %v798_v48 }
 0x29a   :  { %v800_v50 = vpop.f32.mrf.mxu0 }
 0x29b   :  { %1079 = shalt.err (!%p1076_p4)
}
 0x29c   :  { %813 = dma.vmem_to_hbm [thread:$0]  %s811_s5, 128, %s1375_s7, [#allocation3]   ;;  %v1003_v51 = vpop.f32.mrf.mxu0 }
 0x29d   :  { %1088 = dma.done.wait [#allocation3], 128  }
 0x29e   :  { %1089 = vsyncadd [#allocation3], 4294967168 }
 0x29f   :  { %817 = vsyncpa [#allocation3], 1 }

</bundles_post_ra>
